<compile_context>
chip_gen: v6e
topology: v6e:2x2x1
jax: 0.10.0
libtpu: 0.0.40
codegen_flags: <defaults>
</compile_context>

<pallas_src>
import math

import jax
import jax.numpy as jnp
from jax.experimental import pallas as pl
from jax.experimental.pallas import tpu as pltpu


def _round_up(x, m):
    return ((x + m - 1) // m) * m


def _apply_activation(z, activation):
    if activation == "relu":
        return jnp.maximum(z, 0.0)
    if activation == "leaky_relu":
        return jnp.where(z > 0, z, 0.01 * z)
    if activation == "tanh":
        return jnp.tanh(z)
    return z  # activation is None


# ---------------------------------------------------------------------------
# Fused MLP kernel: the whole layer stack is computed on one row-tile of x
# kept in VMEM.  Ref order: x, W0 (BN0 folded), bias-stack, [hidden W stack
# if num_layers > 1], out.
# ---------------------------------------------------------------------------
def _make_fused_mlp_kernel(num_layers, activation, compute_dtype):
    def kernel(*refs):
        x_ref, w0_ref, b_ref = refs[0], refs[1], refs[2]
        if num_layers > 1:
            wh_ref, o_ref = refs[3], refs[4]
        else:
            o_ref = refs[3]

        b_all = b_ref[...]  # (L, d_pad) f32, tiny, VMEM-resident

        # Layer 0: x @ W0 + b0 (BN0 already folded into W0/b0 on the host).
        z = jnp.dot(x_ref[...], w0_ref[...],
                    preferred_element_type=jnp.float32)
        z = z + b_all[0:1, :]

        # Remaining layers: activation of the previous (BN-folded) layer,
        # then Linear.  No activation after the last Linear (matches module).
        for l in range(1, num_layers):
            z = _apply_activation(z, activation)
            z = jnp.dot(z.astype(compute_dtype), wh_ref[l - 1],
                        preferred_element_type=jnp.float32)
            z = z + b_all[l:l + 1, :]

        o_ref[...] = z.astype(o_ref.dtype)

    return kernel


def nn_forward(params, x, *, activation=None, eps=1e-5, tile=512,
               compute_dtype=jnp.bfloat16, out_dtype=jnp.float32):
    """Fused forward pass of the NN module (plain-GAE branch, eval mode)."""
    n, f_in = x.shape
    weights = [jnp.asarray(w, jnp.float32) for w in params["weights"]]
    biases = [jnp.asarray(b, jnp.float32) for b in params["biases"]]
    bn = params["bn"]
    num_layers = len(weights)
    h_out = weights[-1].shape[1]

    # --- Fold eval-mode BatchNorm into the preceding Linear (exact affine) ---
    w_f, b_f = list(weights), list(biases)
    for l in range(num_layers - 1):
        g = jnp.asarray(bn[l]["gamma"], jnp.float32)
        be = jnp.asarray(bn[l]["beta"], jnp.float32)
        m = jnp.asarray(bn[l]["mean"], jnp.float32)
        v = jnp.asarray(bn[l]["var"], jnp.float32)
        scale = g / jnp.sqrt(v + eps)
        shift = be - m * scale
        w_f[l] = w_f[l] * scale[None, :]
        b_f[l] = b_f[l] * scale + shift

    # Common lane-padded width for all hidden/output dims (multiple of 128).
    # (Padded weight rows/cols and padded biases are zero, so padded lanes of
    # z stay exactly zero through every layer and are sliced off at the end.)
    d_pad = _round_up(max(w.shape[1] for w in weights), 128)

    # W0: pad columns only.  x is passed with its TRUE feature width — a block
    # last-dim equal to the full array dim is legal — so no host-side padded
    # copy of x is materialized.
    w0_p = (jnp.zeros((f_in, d_pad), compute_dtype)
            .at[:, :w_f[0].shape[1]].set(w_f[0].astype(compute_dtype)))

    # Hidden/output weights stacked into one operand (one BlockSpec, one DMA).
    if num_layers > 1:
        wh = jnp.zeros((num_layers - 1, d_pad, d_pad), compute_dtype)
        for l in range(1, num_layers):
            wl = w_f[l].astype(compute_dtype)
            wh = wh.at[l - 1, :wl.shape[0], :wl.shape[1]].set(wl)

    # Biases stacked into a single tiny (L, d_pad) f32 operand.
    b_stack = jnp.zeros((num_layers, d_pad), jnp.float32)
    for l in range(num_layers):
        b_stack = b_stack.at[l, :b_f[l].shape[0]].set(b_f[l])

    # Row tile: large for bandwidth, capped so the row grid has >= 2 steps for
    # modest n (lets "parallel" shard across the 2 TensorCores on v7x).
    tile = max(8, min(tile, _round_up(pl.cdiv(n, 2), 8)))
    grid = (pl.cdiv(n, tile),)  # remainder rows handled by partial blocks

    x_c = x if x.dtype == compute_dtype else x.astype(compute_dtype)

    in_specs = [
        pl.BlockSpec((tile, f_in), lambda i: (i, 0)),         # x row tile
        pl.BlockSpec((f_in, d_pad), lambda i: (0, 0)),        # W0 (BN0 folded)
        pl.BlockSpec((num_layers, d_pad), lambda i: (0, 0)),  # bias stack
    ]
    args = [x_c, w0_p, b_stack]
    if num_layers > 1:
        in_specs.append(
            pl.BlockSpec((num_layers - 1, d_pad, d_pad),
                         lambda i: (0, 0, 0)))                # hidden W stack
        args.append(wh)

    kernel = _make_fused_mlp_kernel(num_layers, activation, compute_dtype)
    out = pl.pallas_call(
        kernel,
        out_shape=jax.ShapeDtypeStruct((n, d_pad), out_dtype),
        grid=grid,
        in_specs=in_specs,
        out_specs=pl.BlockSpec((tile, d_pad), lambda i: (i, 0)),
        compiler_params=pltpu.CompilerParams(
            dimension_semantics=("parallel",)),
    )(*args)
    # NOTE: consumers that can take the lane-padded slab should use `out`
    # directly and skip this extra copy.
    return out[:, :h_out]


# ---------------------------------------------------------------------------
# Pure-JAX reference (mirrors the PyTorch forward exactly, eval mode).
# ---------------------------------------------------------------------------
def nn_reference(params, x, *, activation=None, eps=1e-5):
    z = x.astype(jnp.float32)
    weights, biases, bn = params["weights"], params["biases"], params["bn"]
    num_layers = len(weights)
    for i in range(num_layers):
        z = z @ weights[i] + biases[i]
        if i < num_layers - 1:
            b = bn[i]
            z = (z - b["mean"]) / jnp.sqrt(b["var"] + eps) * b["gamma"] + b["beta"]
            z = _apply_activation(z, activation)
    return z


if __name__ == "__main__":
    # Small deterministic problem: 64 nodes, 16 input features, hidden=32,
    # num_layers=3, activation='relu', dropout=0.0, eval-mode BatchNorm.
    N, F_IN, H = 64, 16, 32
    NUM_LAYERS = 3
    ACTIVATION = "relu"

    key = jax.random.PRNGKey(0)
    k_x, k_w, k_b, k_bn = jax.random.split(key, 4)

    x = jax.random.normal(k_x, (N, F_IN), dtype=jnp.float32)

    # Linear weights in (in, out) layout (equivalent to torch W.T), biases.
    w_keys = jax.random.split(k_w, NUM_LAYERS)
    b_keys = jax.random.split(k_b, NUM_LAYERS)
    weights = [jax.random.normal(w_keys[0], (F_IN, H), dtype=jnp.float32)
               * (1.0 / math.sqrt(F_IN))]
    for i in range(1, NUM_LAYERS):
        weights.append(jax.random.normal(w_keys[i], (H, H), dtype=jnp.float32)
                       * (1.0 / math.sqrt(H)))
    biases = [0.01 * jax.random.normal(b_keys[i], (H,), dtype=jnp.float32)
              for i in range(NUM_LAYERS)]

    # Eval-mode BatchNorm1d params (running stats).
    bn_keys = jax.random.split(k_bn, NUM_LAYERS - 1)
    bn_params = []
    for k in bn_keys:
        kg, kb, km, kv = jax.random.split(k, 4)
        bn_params.append({
            "gamma": 1.0 + 0.1 * jax.random.normal(kg, (H,), dtype=jnp.float32),
            "beta": 0.1 * jax.random.normal(kb, (H,), dtype=jnp.float32),
            "mean": 0.1 * jax.random.normal(km, (H,), dtype=jnp.float32),
            "var": jnp.abs(1.0 + 0.1 * jax.random.normal(kv, (H,), dtype=jnp.float32)),
        })

    params = {"weights": weights, "biases": biases, "bn": bn_params}

    z_ref = nn_reference(params, x, activation=ACTIVATION)

    # Default (perf) path: bf16 operands, f32 accumulation.
    z_bf16 = jax.block_until_ready(nn_forward(params, x, activation=ACTIVATION))
    assert z_bf16.shape == (N, H) and z_bf16.dtype == jnp.float32
    assert bool(jnp.all(jnp.isfinite(z_bf16)))
    err_bf16 = float(jnp.max(jnp.abs(z_bf16 - z_ref)))
    assert err_bf16 < 1e-1, f"bf16 path mismatch vs reference: {err_bf16}"

    # f32 path: validates the fused structure / BN folding tightly.
    z_f32 = jax.block_until_ready(
        nn_forward(params, x, activation=ACTIVATION,
                   compute_dtype=jnp.float32))
    err_f32 = float(jnp.max(jnp.abs(z_f32 - z_ref)))
    assert err_f32 < 2e-2, f"f32 path mismatch vs reference: {err_f32}"

    print("KERNEL_OK")
</pallas_src>

<mosaic_0001>
module attributes {stable_mosaic.version = 11 : i64} {
  func.func @kernel(%arg0: i32, %arg1: memref<32x16xbf16, #tpu.memory_space<vmem>>, %arg2: memref<16x128xbf16, #tpu.memory_space<vmem>>, %arg3: memref<3x128xf32, #tpu.memory_space<vmem>>, %arg4: memref<2x128x128xbf16, #tpu.memory_space<vmem>>, %arg5: memref<32x128xf32, #tpu.memory_space<vmem>>) attributes {dimension_semantics = [#tpu.dimension_semantics<parallel>], iteration_bounds = array<i64: 2>, scalar_prefetch = 0 : i64, scratch_operands = 0 : i64, tpu.core_type = #tpu.core_type<tc>, window_params = [{transform_indices = @transform_0, window_bounds = array<i64: 32, 16>}, {pipeline_mode = #tpu.pipeline_mode<synchronous>, transform_indices = @transform_1, window_bounds = array<i64: 16, 128>}, {pipeline_mode = #tpu.pipeline_mode<synchronous>, transform_indices = @transform_2, window_bounds = array<i64: 3, 128>}, {pipeline_mode = #tpu.pipeline_mode<synchronous>, transform_indices = @transform_3, window_bounds = array<i64: 2, 128, 128>}, {transform_indices = @transform_4, window_bounds = array<i64: 32, 128>}]} {
    %c0 = arith.constant 0 : index
    %c0_0 = arith.constant 0 : index
    %0 = vector.load %arg3[%c0, %c0_0] : memref<3x128xf32, #tpu.memory_space<vmem>>, vector<3x128xf32>
    %c0_1 = arith.constant 0 : index
    %c0_2 = arith.constant 0 : index
    %1 = vector.load %arg1[%c0_1, %c0_2] : memref<32x16xbf16, #tpu.memory_space<vmem>>, vector<32x16xbf16>
    %c0_3 = arith.constant 0 : index
    %c0_4 = arith.constant 0 : index
    %2 = vector.load %arg2[%c0_3, %c0_4] : memref<16x128xbf16, #tpu.memory_space<vmem>>, vector<16x128xbf16>
    %cst = arith.constant dense<0.000000e+00> : vector<32x128xf32>
    %3 = tpu.matmul %1, %2, %cst {dimension_numbers = #tpu.dot_dimension_numbers<[1], [0], [0], [1], [0, 0, 1, 1], [], []>} : vector<32x16xbf16>, vector<16x128xbf16>, vector<32x128xf32> -> vector<32x128xf32>
    %4 = vector.extract_strided_slice %0 {offsets = [0, 0], sizes = [1, 128], strides = [1, 1]} : vector<3x128xf32> to vector<1x128xf32>
    %5 = vector.broadcast %4 : vector<1x128xf32> to vector<32x128xf32>
    %6 = arith.addf %3, %5 : vector<32x128xf32>
    %cst_5 = arith.constant 0.000000e+00 : f32
    %7 = vector.broadcast %cst_5 : f32 to vector<32x128xf32>
    %8 = arith.maximumf %6, %7 : vector<32x128xf32>
    %9 = arith.truncf %8 : vector<32x128xf32> to vector<32x128xbf16>
    %c0_6 = arith.constant 0 : index
    %c0_7 = arith.constant 0 : index
    %c0_8 = arith.constant 0 : index
    %10 = vector.load %arg4[%c0_6, %c0_7, %c0_8] : memref<2x128x128xbf16, #tpu.memory_space<vmem>>, vector<1x128x128xbf16>
    %11 = vector.shape_cast %10 : vector<1x128x128xbf16> to vector<128x128xbf16>
    %cst_9 = arith.constant dense<0.000000e+00> : vector<32x128xf32>
    %12 = tpu.matmul %9, %11, %cst_9 {dimension_numbers = #tpu.dot_dimension_numbers<[1], [0], [0], [1], [0, 0, 1, 1], [], []>} : vector<32x128xbf16>, vector<128x128xbf16>, vector<32x128xf32> -> vector<32x128xf32>
    %13 = vector.extract_strided_slice %0 {offsets = [1, 0], sizes = [1, 128], strides = [1, 1]} : vector<3x128xf32> to vector<1x128xf32>
    %14 = vector.broadcast %13 : vector<1x128xf32> to vector<32x128xf32>
    %15 = arith.addf %12, %14 : vector<32x128xf32>
    %cst_10 = arith.constant 0.000000e+00 : f32
    %16 = vector.broadcast %cst_10 : f32 to vector<32x128xf32>
    %17 = arith.maximumf %15, %16 : vector<32x128xf32>
    %18 = arith.truncf %17 : vector<32x128xf32> to vector<32x128xbf16>
    %c1 = arith.constant 1 : index
    %c0_11 = arith.constant 0 : index
    %c0_12 = arith.constant 0 : index
    %19 = vector.load %arg4[%c1, %c0_11, %c0_12] : memref<2x128x128xbf16, #tpu.memory_space<vmem>>, vector<1x128x128xbf16>
    %20 = vector.shape_cast %19 : vector<1x128x128xbf16> to vector<128x128xbf16>
    %cst_13 = arith.constant dense<0.000000e+00> : vector<32x128xf32>
    %21 = tpu.matmul %18, %20, %cst_13 {dimension_numbers = #tpu.dot_dimension_numbers<[1], [0], [0], [1], [0, 0, 1, 1], [], []>} : vector<32x128xbf16>, vector<128x128xbf16>, vector<32x128xf32> -> vector<32x128xf32>
    %22 = vector.extract_strided_slice %0 {offsets = [2, 0], sizes = [1, 128], strides = [1, 1]} : vector<3x128xf32> to vector<1x128xf32>
    %23 = vector.broadcast %22 : vector<1x128xf32> to vector<32x128xf32>
    %24 = arith.addf %21, %23 : vector<32x128xf32>
    %c0_14 = arith.constant 0 : index
    %c0_15 = arith.constant 0 : index
    %25 = vector.load %arg5[%c0_14, %c0_15] : memref<32x128xf32, #tpu.memory_space<vmem>>, vector<32x128xf32>
    tpu.vector_store %arg5[%c0_14, %c0_15], %24 {strides = array<i32>} : memref<32x128xf32, #tpu.memory_space<vmem>>, vector<32x128xf32>,
    return
  }
  func.func @transform_0(%arg0: i32) -> (i32, i32) {
    %c0_i32 = arith.constant 0 : i32
    %c0_i32_0 = arith.constant 0 : i32
    return %arg0, %c0_i32 : i32, i32
  }
  func.func @transform_1(%arg0: i32) -> (i32, i32) {
    %c0_i32 = arith.constant 0 : i32
    %c0_i32_0 = arith.constant 0 : i32
    %c0_i32_1 = arith.constant 0 : i32
    return %c0_i32, %c0_i32_0 : i32, i32
  }
  func.func @transform_2(%arg0: i32) -> (i32, i32) {
    %c0_i32 = arith.constant 0 : i32
    %c0_i32_0 = arith.constant 0 : i32
    %c0_i32_1 = arith.constant 0 : i32
    return %c0_i32, %c0_i32_0 : i32, i32
  }
  func.func @transform_3(%arg0: i32) -> (i32, i32, i32) {
    %c0_i32 = arith.constant 0 : i32
    %c0_i32_0 = arith.constant 0 : i32
    %c0_i32_1 = arith.constant 0 : i32
    %c0_i32_2 = arith.constant 0 : i32
    return %c0_i32, %c0_i32_0, %c0_i32_1 : i32, i32, i32
  }
  func.func @transform_4(%arg0: i32) -> (i32, i32) {
    %c0_i32 = arith.constant 0 : i32
    %c0_i32_0 = arith.constant 0 : i32
    return %arg0, %c0_i32 : i32, i32
  }
}

</mosaic_0001>

<bundles_post_ra>
// kernel: tpu_custom_call.1
= control target key start
LH: loop header
LB: loop body
LE: loop exit
PB: predicated region body
PF: predicated region fallthrough
CT: control target
= control target key end

     0   :  { %9 = vsyncpa [#allocation3], 0  ;;  %s1063_s0 = inlined_call_operand.vmem [shape: bf16[64,16], index: 0, kind: input, shape index: {}]   ;;  %s1064_s1 = inlined_call_operand.vmem [shape: bf16[16,128], index: 1, kind: input, shape index: {}]   ;;  %s1065_s2 = inlined_call_operand.vmem [shape: f32[3,128], index: 2, kind: input, shape index: {}]   ;;  %s1066_s3 = inlined_call_operand.hbm [shape: bf16[2,128,128], index: 3, kind: input, shape index: {}]   ;;  %s1067_s4 = inlined_call_operand.hbm [shape: f32[64,128], index: 4, kind: output, shape index: {}]  }
   0x1   :  { %10 = vsyncpa [#allocation4], 0 }
   0x2   :  { %12 = vsyncpa [#allocation4 + $0x1], 0  ;;  %s938_s15 = smov 0   ;;  %s940_s16 = smov 0  }
   0x3   :  { %s942_s17 = smov 0   ;;  %s944_s18 = smov 0  }
   0x4 LB: > { %s959_s19 = sadd.s32 4294967295, %s905_s18   ;;  %s637_s20 = sadd.s32 4294967294, %s905_s18   ;;  %s905_s18 = sphi %s944_s18, %s1075_s18   ;;  %s901_s17 = sphi %s942_s17, %s1074_s17   ;;  %s897_s16 = sphi %s940_s16, %s1073_s16   ;;  %s893_s15 = sphi %s938_s15, %s1072_s15  }
   0x5   : > { %s963_s21 = sadd.s32 1, %s905_s18   ;;  %s114_s22 = sadd.s32 1, %s901_s17 }
   0x6   : > { %s111_s23 = ssub.s32 %s905_s18, %s963_s21  ;;  %p124_p0 = scmp.ne.s32.totalorder %s901_s17, %s897_s16 }
   0x7   : > { %p112_p1 = scmp.eq.s32.totalorder %s111_s23, 0  ;;  %p125_p2 = scmp.eq.s32.totalorder %s959_s19, 1 }
   0x8   : > { %p130_p3 = scmp.ne.s32.totalorder %s897_s16, %s893_s15  ;;  %p131_p4 = scmp.eq.s32.totalorder %s637_s20, 1 }
   0x9   : > { %s974_s24 = scalar_select %p112_p1, %s901_s17, %s114_s22  }
   0xa   : > { %p976_p5 = por %p125_p2, %p124_p0  ;;  %p980_p6 = por %p131_p4, %p130_p3 }
   0xb   : > { %p638_p7 = scmp.ge.s32.totalorder %s905_s18, 1  ;;  %p138_p8 = scmp.lt.s32.totalorder %s905_s18, 3 }
   0xc   : > { %s1069_s26 = scalar_select %p980_p6, 1, 0 }
   0xd   : > { %p756_p9 = scmp.eq.s32.totalorder %s959_s19, 0  ;;  %p987_p10 = pnand %p638_p7, %p138_p8 }
   0xe   : > { %s907_s28 = smov [#allocation2]  }
   0xf   : > { %s156_s29 = sshll.u32 %s907_s28, 4  ;;  %p748_p11 = pneg %p987_p10  ;;  %s157_s29 = int_to_ptr.vmem [resolvable:$true] %s156_s29 }
  0x10   : > { %s826_s30 = scalar_lea.vmem %s157_s29, 2048  ;;  %p834_p3 = scmp.lt.s32.totalorder %s157_s29, %s157_s29 }
  0x11   : > { %p749_p12 = pnand %p756_p9, %p748_p11  ;;  %p827_p0 = scmp.ne.s32.totalorder %s157_s29, %s826_s30 }
  0x12   : > { %p835_p4 = scmp.lt.s32.totalorder %s826_s30, %s826_s30 }
  0x13   : > { %p817_p13 = pneg %p749_p12 }
  0x14   : > { %p836_p6 = por %p835_p4, %p834_p3 }
  0x15   : > { %p829_p1 = pnand %p827_p0, %p817_p13 }
  0x17   : > { %p830_p2 = pneg %p829_p1 }
  0x19   : > { %p837_p7 = pnand %p836_p6, %p830_p2 }
  0x1b   : > { %840 = shalt.err (!%p837_p7)
}
  0x1c   : > { %s908_s5 = smov 64   ;;  %s909_s6 = smov 4  }
  0x1d   : > { %751 = dma.hbm_to_vmem [thread:$0]  (!%p749_p12), %s1066_s3, 2048, %s157_s29, [#allocation3], %s908_s5, %s908_s5, %s909_s6  }
  0x1e   : > { %181 = sbr.rel (%p987_p10) target bundleno = 671 (0x29f), region = 36 }
  0x23   : > { %884 = dma.done.wait (%p756_p9), [#allocation3], 2048  }
  0x24   : > { %886 = vsyncadd (%p756_p9), [#allocation3], 4294965248  ;;  %s644_s9 = sshll.u32 %s959_s19, 2  ;;  %v796_v0 = vld [vmem:[%s1064_s1] sm:$0xff]   ;;  %vm242_vm0 = vcmask 130048   ;;  %v799_v3 = vld [vmem:[#allocation2 + $0x38] sm:$0xff]   ;;  %v222_v16 = vlaneseq }
  0x25   : > { %p208_p8 = scmp.lt.s32.totalorder %s644_s9, 7  ;;  %696 = vmatprep.subr.bf16.mxu0 %v796_v0  ;;  %v800_v4 = vld [vmem:[#allocation2 + $0x30] sm:$0xff]   ;;  %702 = vmatprep.subr.bf16.mxu1 %v799_v3  ;;  %v801_v5 = vld [vmem:[#allocation2 + $0x28] sm:$0xff]   ;;  %v802_v6 = vld [vmem:[#allocation2 + $0x20] sm:$0xff]   ;;  %s204_s27 = sand.u32 1, %s897_s16  }
  0x26   : > { %697 = vmatpush3.bf16.msra.mxu0 %v796_v0  ;;  %703 = vmatpush3.bf16.msra.mxu1 %v799_v3  ;;  %v803_v7 = vld [vmem:[#allocation2 + $0x18] sm:$0xff]   ;;  %v804_v8 = vld [vmem:[#allocation2 + $0x10] sm:$0xff]   ;;  %v805_v9 = vld [vmem:[#allocation2 + $0x8] sm:$0xff]   ;;  %v223_v17 = vshrl.u32 %v222_v16, 7  ;;  %s643_s28 = sshll.u32 %s204_s27, 5  ;;  %s672_s5 = sshll.u32 %s959_s19, 9 }
  0x27   : > { %s1077_s9 = smov (!%p208_p8, %s644_s9), 7  ;;  %704 = vmatprep.subr.bf16.mxu1 %v800_v4  ;;  %v806_v10 = vld [vmem:[#allocation2] sm:$0xff]   ;;  %v807_v11 = vld [vmem:[#allocation2 + $0x78] sm:$0xff]   ;;  %v808_v12 = vld [vmem:[#allocation2 + $0x70] sm:$0xff]   ;;  %s206_s29 = scalar_lea.vmem [#allocation5], %s643_s28 }
  0x28   : > { %s645_s10 = sshll.u32 %s1077_s9, 2  ;;  %722 = vmatprep.subr.bf16.mxu0 %v807_v11  ;;  %v809_v13 = vld [vmem:[#allocation2 + $0x68] sm:$0xff]   ;;  %v810_v14 = vld [vmem:[#allocation2 + $0x60] sm:$0xff]   ;;  %v811_v15 = vld [vmem:[#allocation2 + $0x58] sm:$0xff]   ;;  %v224_v18 = vsub.s32 0, %v223_v17  ;;  %v322_v38 = vsub.s32 1, %v223_v17  ;;  %s1021_s8 = scalar_lea.hbm %s1067_s4, %s672_s5 }
  0x29   : > { %s211_s13 = scalar_lea.vmem %s1063_s0, %s645_s10  ;;  %v215_v19 = vld [vmem:[%s1065_s2] sm:$0x7]  ;;  %v812_v35 = vld [vmem:[#allocation2 + $0x50] sm:$0xff]   ;;  %v813_v36 = vld [vmem:[#allocation2 + $0x48] sm:$0xff]   ;;  %v446_v54 = vsub.s32 2, %v223_v17  ;;  %s563_s30 = sshll.u32 %s206_s29, 4  ;;  %s1016_s30 = int_to_ptr.vmem [resolvable:$true] %s563_s30 }
  0x2a   : > { %v797_v1 = vld [vmem:[%s211_s13] sm:$0xff]   ;;  %v798_v2 = vld [vmem:[%s211_s13 + $0x8] sm:$0xff]   ;;  %705 = vmatpush3.bf16.msra.mxu1 %v800_v4  ;;  %v225_v21 = vrot.slane %v215_v19, %v224_v18  ;;  %v323_v40 = vrot.slane %v215_v19, %v322_v38  ;;  %s1023_s9 = scalar_lea.sflag [#allocation4], %s204_s27  ;;  %s841_s19 = scalar_lea.vmem %s1016_s30, 512 }
  0x2b   : > { %698 = vmatprep.mubr.msk.bf16.mxu0 %vm242_vm0, %v797_v1  ;;  %706 = vmatprep.subr.bf16.mxu1 %v801_v5  ;;  %v814_v37 = vld [vmem:[#allocation2 + $0x40] sm:$0xff]   ;;  %v447_v55 = vrot.slane %v215_v19, %v446_v54  ;;  %p842_p6 = scmp.ne.s32.totalorder %s1016_s30, %s841_s19  ;;  %s910_s10 = smov [#allocation5]  }
  0x2c   : > { %699 = vmatmul.mubr.msk.bf16.vlgmr.msra.gmra.mxu0 %vm242_vm0, %v798_v2  ;;  %s845_s11 = sshll.u32 %s910_s10, 4  ;;  %s846_s11 = int_to_ptr.vmem [resolvable:$false] %s845_s11 }
  0x2d   : > { %723 = vmatpush3.bf16.msra.mxu0 %v807_v11  ;;  %p843_p9 = pnand %p842_p6, %p976_p5  ;;  %s847_s12 = scalar_lea.vmem %s846_s11, 1024 }
  0x2e   : > { %707 = vmatpush3.bf16.msra.mxu1 %v801_v5  ;;  %724 = vmatprep.subr.bf16.mxu0 %v808_v12  ;;  %p848_p11 = scmp.lt.s32.totalorder %s1016_s30, %s846_s11  ;;  %p849_p12 = scmp.lt.s32.totalorder %s847_s12, %s841_s19 }
  0x2f   : > { %708 = vmatprep.subr.bf16.mxu1 %v802_v6  ;;  %p844_p10 = pneg %p843_p9 }
  0x30   : > { %p850_p13 = por %p849_p12, %p848_p11 }
  0x31   : > { %725 = vmatpush3.bf16.msra.mxu0 %v808_v12 }
  0x32   : > { %709 = vmatpush3.bf16.msra.mxu1 %v802_v6  ;;  %726 = vmatprep.subr.bf16.mxu0 %v809_v13  ;;  %p851_p0 = pnand %p850_p13, %p844_p10 }
  0x33   : > { %710 = vmatprep.subr.bf16.mxu1 %v803_v7 }
  0x35   : > { %727 = vmatpush3.bf16.msra.mxu0 %v809_v13 }
  0x36   : > { %711 = vmatpush3.bf16.msra.mxu1 %v803_v7  ;;  %728 = vmatprep.subr.bf16.mxu0 %v810_v14 }
  0x37   : > { %712 = vmatprep.subr.bf16.mxu1 %v804_v8 }
  0x39   : > { %729 = vmatpush3.bf16.msra.mxu0 %v810_v14 }
  0x3a   : > { %713 = vmatpush3.bf16.msra.mxu1 %v804_v8  ;;  %730 = vmatprep.subr.bf16.mxu0 %v811_v15 }
  0x3b   : > { %714 = vmatprep.subr.bf16.mxu1 %v805_v9 }
  0x3d   : > { %731 = vmatpush3.bf16.msra.mxu0 %v811_v15 }
  0x3e   : > { %715 = vmatpush3.bf16.msra.mxu1 %v805_v9  ;;  %732 = vmatprep.subr.bf16.mxu0 %v812_v35 }
  0x3f   : > { %716 = vmatprep.subr.bf16.mxu1 %v806_v10 }
  0x41   : > { %733 = vmatpush3.bf16.msra.mxu0 %v812_v35 }
  0x42   : > { %717 = vmatpush3.bf16.msra.mxu1 %v806_v10  ;;  %734 = vmatprep.subr.bf16.mxu0 %v813_v36 }
  0x45   : > { %735 = vmatpush3.bf16.msra.mxu0 %v813_v36 }
  0x46   : > { %736 = vmatprep.subr.bf16.mxu0 %v814_v37 }
  0x49   : > { %737 = vmatpush3.bf16.msra.mxu0 %v814_v37 }
  0xec   : > { %v700_v20 = vpop.f32.mrf.mxu0 }
  0xed   : > { %v292_v26 = vadd.f32 %v700_v20, %v225_v21 }
  0xee   : > { %v283_v22 = vpop.f32.mrf.mxu0 }
  0xef   : > { %v284_v24 = vadd.f32 %v283_v22, %v225_v21  ;;  %v300_v32 = vmax.f32 %v292_v26, 0.0 }
  0xf0   : > { %v701_v23 = vpop.f32.mrf.mxu0 }
  0xf1   : > { %v295_v25 = vadd.f32 %v701_v23, %v225_v21  ;;  %v298_v30 = vmax.f32 %v284_v24, 0.0 }
  0xf2   : > { %v286_v27 = vpop.f32.mrf.mxu0 }
  0xf3   : > { %v287_v28 = vadd.f32 %v286_v27, %v225_v21  ;;  %v301_v29 = vmax.f32 %v295_v25, 0.0 }
  0xf5   : > { %v299_v31 = vmax.f32 %v287_v28, 0.0  ;;  %v303_v34 = vpack.c.bf16 %v301_v29, %v300_v32 }
  0xf7   : > { %v302_v33 = vpack.c.bf16 %v299_v31, %v298_v30 }
  0xf9   : > { %718 = vmatprep.mubr.bf16.mxu1 %v302_v33 }
  0xfa   : > { %719 = vmatmul.mubr.bf16.vlgmr.msra.gmra.mxu1 %v303_v34 }
 0x1ba   : > { %v720_v39 = vpop.f32.mrf.mxu1 }
 0x1bb   : > { %v415_v45 = vadd.f32 %v720_v39, %v323_v40 }
 0x1bc   : > { %v406_v41 = vpop.f32.mrf.mxu1 }
 0x1bd   : > { %v407_v43 = vadd.f32 %v406_v41, %v323_v40  ;;  %v423_v51 = vmax.f32 %v415_v45, 0.0 }
 0x1be   : > { %v721_v42 = vpop.f32.mrf.mxu1 }
 0x1bf   : > { %v418_v44 = vadd.f32 %v721_v42, %v323_v40  ;;  %v421_v49 = vmax.f32 %v407_v43, 0.0 }
 0x1c0   : > { %v409_v46 = vpop.f32.mrf.mxu1 }
 0x1c1   : > { %v410_v47 = vadd.f32 %v409_v46, %v323_v40  ;;  %v424_v48 = vmax.f32 %v418_v44, 0.0 }
 0x1c3   : > { %v422_v50 = vmax.f32 %v410_v47, 0.0  ;;  %v426_v53 = vpack.c.bf16 %v424_v48, %v423_v51 }
 0x1c5   : > { %v425_v52 = vpack.c.bf16 %v422_v50, %v421_v49 }
 0x1c7   : > { %738 = vmatprep.mubr.bf16.mxu0 %v425_v52 }
 0x1c8   : > { %739 = vmatmul.mubr.bf16.vlgmr.msra.gmra.mxu0 %v426_v53 }
 0x288   : > { %v740_v56 = vpop.f32.mrf.mxu0 }
 0x289   : > { %v539_v57 = vadd.f32 %v740_v56, %v447_v55 }
 0x28a   : > { %v530_v58 = vpop.f32.mrf.mxu0 }
 0x28b   : > { %547 = vst [vmem:[%s206_s29 + $0x10] sm:$0xff] %v539_v57  ;;  %v531_v59 = vadd.f32 %v530_v58, %v447_v55 }
 0x28c   : > { %v741_v60 = vpop.f32.mrf.mxu0 }
 0x28d   : > { %545 = vst [vmem:[%s206_s29] sm:$0xff] %v531_v59  ;;  %v542_v61 = vadd.f32 %v741_v60, %v447_v55 }
 0x28e   : > { %v533_v62 = vpop.f32.mrf.mxu0 }
 0x28f   : > { %548 = vst [vmem:[%s206_s29 + $0x18] sm:$0xff] %v542_v61  ;;  %v534_v63 = vadd.f32 %v533_v62, %v447_v55 }
 0x291   : > { %546 = vst [vmem:[%s206_s29 + $0x8] sm:$0xff] %v534_v63 }
 0x292   : > { %854 = shalt.err (!%p851_p0)
}
 0x293   : > { %s855_s13 = scalar_lea.hbm %s1021_s8, 512  ;;  %s859_s22 = scalar_lea.hbm %s1067_s4, 1024 }
 0x294   : > { %p856_p1 = scmp.ne.s32.totalorder %s1021_s8, %s855_s13  ;;  %p860_p4 = scmp.lt.s32.totalorder %s1021_s8, %s1067_s4 }
 0x295   : > { %p861_p7 = scmp.lt.s32.totalorder %s859_s22, %s855_s13 }
 0x296   : > { %p857_p2 = pnand %p856_p1, %p976_p5 }
 0x297   : > { %p862_p8 = por %p861_p7, %p860_p4 }
 0x298   : > { %p858_p3 = pneg %p857_p2 }
 0x29a   : > { %p863_p6 = pnand %p862_p8, %p858_p3 }
 0x29c   : > { %866 = shalt.err (!%p863_p6)
}
 0x29d   : > { %s911_s28 = smov 128   ;;  %s912_s29 = smov 8  }
 0x29e   : > { %746 = dma.vmem_to_hbm [thread:$0]  (%p976_p5), %s1016_s30, 512, %s1021_s8, %s1023_s9, %s911_s28, %s911_s28, %s912_s29  }
 0x29f PF: > { %p758_p9 = scmp.ge.s32.totalorder %s905_s18, 2  ;;  %s578_s5 = sand.u32 1, %s893_s15  }
 0x2a0   : > { %p1071_p10 = scmp.ne.s32.totalorder %s1069_s26, 0  ;;  %s579_s6 = scalar_lea.sflag [#allocation4], %s578_s5 }
 0x2a2   : > { %p753_p11 = pnand %p758_p9, %p1071_p10 }
 0x2a4   : > { %p754_p12 = pneg %p753_p11 }
 0x2a6   : > { %888 = dma.done.wait (%p754_p12), %s579_s6, 512  }
 0x2a7   : > { %890 = vsyncadd (%p754_p12), %s579_s6, 4294966784  ;;  %p15_p13 = scmp.ge.s32.totalorder %s963_s21, 4   ;;  %s1072_s15 = smov %s897_s16 }
 0x2a8   : > { %s1073_s16 = smov %s901_s17  ;;  %s1074_s17 = smov %s974_s24 }
 0x2a9   : > { %s1075_s18 = smov %s963_s21  ;;  %17 = sbr.rel (!%p15_p13) target bundleno = 4 (0x4), region = 77 }
 0x2ae   :  { %584 = vsyncpa [#allocation3], 1 }
 0x2af   :  { %586 = vsyncpa [#allocation3 + $0x1], 1 }
 0x2b0   :  { %587 = vsyncpa [#allocation4], 1 }
 0x2b1   :  { %589 = vsyncpa [#allocation4 + $0x1], 1 }

</bundles_post_ra>
